<compile_context>
chip_gen: v6e
topology: v6e:2x2x1
jax: 0.10.0
libtpu: 0.0.40
codegen_flags: <defaults>
</compile_context>

<pallas_src>
import functools
import math

import jax
import jax.numpy as jnp
import numpy as np
from jax.experimental import pallas as pl
from jax.experimental.pallas import tpu as pltpu

H = 32  # args.feature_dim


# ------------------------------- fused kernel -------------------------------

def _agent_enhancer_kernel(len_ref, lane_ref,       # [TB,1] int32 (VMEM)
                           node_ref, agent_ref,     # [TB,N,H] bf16, [TB,H] f32
                           wq_ref, bq_ref,          # [H,2H], [1,2H]  (scale folded in)
                           wkv_ref, bkv_ref,        # [H,4H] bf16, [1,4H] f32
                           out_ref):                # [TB,3H] f32
    TB, N, Hd = node_ref.shape
    agent = agent_ref[...]                                   # [TB, H]  f32
    nodes = node_ref[...]                                    # [TB, N, H] bf16

    # Fused Q projection for both attentions: one [TB,H]@[H,2H] matmul.
    q = jnp.dot(agent, wq_ref[...],
                preferred_element_type=jnp.float32) + bq_ref[...]   # [TB, 2H]

    # Fused K/V projection for both attentions: one lane-dense
    # [TB*N, H] @ [H, 4H] bf16 matmul, f32 accumulation.
    nodes2d = nodes.reshape(TB * N, Hd)
    kv2d = jnp.dot(nodes2d, wkv_ref[...],
                   preferred_element_type=jnp.float32) + bkv_ref[...]
    kv = kv2d.reshape(TB, N, 4 * Hd)            # [k_scene | v_scene | k_lane | v_lane]

    # Validity masks, vectorized over the batch tile.
    col = jax.lax.broadcasted_iota(jnp.int32, (TB, N, 1), 1)  # [TB, N, 1]
    length = len_ref[...].reshape(TB, 1, 1)
    lane0 = lane_ref[...].reshape(TB, 1, 1)
    valid_scene = col < length
    valid_lane = (col >= lane0) & (col < length)

    def attend(q_h, k, v, valid):
        # scores via VPU multiply + lane reduce (MXU would be <1% utilized here)
        s = jnp.sum(q_h[:, None, :] * k, axis=-1, keepdims=True)      # [TB,N,1]
        s = jnp.where(valid, s, -1e30)
        s = s - jnp.max(s, axis=1, keepdims=True)
        # keep the valid multiply: an all-masked (empty) key set must produce a
        # zero context row, matching the PyTorch empty-slice behaviour.
        p = jnp.exp(s) * valid.astype(jnp.float32)
        denom = jnp.sum(p, axis=1, keepdims=True)
        inv = pl.reciprocal(jnp.maximum(denom, 1e-30), approx=True)   # EUP slot
        return jnp.sum((p * inv) * v, axis=1)                         # [TB, H]

    ctx_scene = attend(q[:, 0:Hd],
                       kv[:, :, 0:Hd], kv[:, :, Hd:2 * Hd], valid_scene)
    ctx_lane = attend(q[:, Hd:2 * Hd],
                      kv[:, :, 2 * Hd:3 * Hd], kv[:, :, 3 * Hd:4 * Hd], valid_lane)

    # Single lane-wide store of the concatenated result.
    out_ref[...] = jnp.concatenate([agent, ctx_scene, ctx_lane], axis=-1)


# ------------------------------ kernel wrapper -------------------------------

def agent_feature_enhancer_forward(packed, node_features, agent_feature,
                                   input_lengths, lane_polylines, *, tb=128):
    """Returns improved_agent_features of shape [B, 3*hidden]."""
    B, N, Hd = node_features.shape

    TB = B if B < tb else tb                 # small batches: one full-batch block
    num_tiles = pl.cdiv(B, TB)
    B_pad = num_tiles * TB

    lengths = input_lengths.reshape(B, 1).astype(jnp.int32)
    lanes = lane_polylines.reshape(B, 1).astype(jnp.int32)
    nodes = node_features.astype(jnp.bfloat16)          # halves HBM read traffic
    agent = agent_feature.astype(jnp.float32)

    if B_pad != B:
        pad = B_pad - B
        nodes = jnp.pad(nodes, ((0, pad), (0, 0), (0, 0)))
        agent = jnp.pad(agent, ((0, pad), (0, 0)))
        lengths = jnp.pad(lengths, ((0, pad), (0, 0)))   # length 0 -> zero context
        lanes = jnp.pad(lanes, ((0, pad), (0, 0)))

    resident = lambda i: (0, 0)                          # weights stay VMEM-resident

    out = pl.pallas_call(
        _agent_enhancer_kernel,
        out_shape=jax.ShapeDtypeStruct((B_pad, 3 * Hd), jnp.float32),
        grid=(num_tiles,),
        in_specs=[
            pl.BlockSpec((TB, 1), lambda i: (i, 0)),          # input_lengths
            pl.BlockSpec((TB, 1), lambda i: (i, 0)),          # lane_polylines
            pl.BlockSpec((TB, N, Hd), lambda i: (i, 0, 0)),   # node_features tile
            pl.BlockSpec((TB, Hd), lambda i: (i, 0)),         # agent_feature tile
            pl.BlockSpec((Hd, 2 * Hd), resident),             # packed Wq
            pl.BlockSpec((1, 2 * Hd), resident),              # packed bq
            pl.BlockSpec((Hd, 4 * Hd), resident),             # packed Wkv (bf16)
            pl.BlockSpec((1, 4 * Hd), resident),              # packed bkv
        ],
        out_specs=pl.BlockSpec((TB, 3 * Hd), lambda i: (i, 0)),
        compiler_params=pltpu.CompilerParams(
            dimension_semantics=("parallel",)),               # megacore on v7x
    )(lengths, lanes, nodes, agent,
      packed["wq"], packed["bq"], packed["wkv"], packed["bkv"])

    return out[:B] if B_pad != B else out


# ------------------------------ parameter prep -------------------------------

def _init_linear(key, in_f, out_f):
    kw, kb = jax.random.split(key)
    bound = 1.0 / math.sqrt(in_f)
    w = jax.random.uniform(kw, (in_f, out_f), jnp.float32, -bound, bound)  # W^T
    b = jax.random.uniform(kb, (1, out_f), jnp.float32, -bound, bound)
    return w, b


def _init_cross_attention(key, hidden):
    kq, kk, kv = jax.random.split(key, 3)
    wq, bq = _init_linear(kq, hidden, hidden)
    wk, bk = _init_linear(kk, hidden, hidden)
    wv, bv = _init_linear(kv, hidden, hidden)
    return {"wq": wq, "bq": bq, "wk": wk, "bk": bk, "wv": wv, "bv": bv}


def init_agent_feature_enhancer(key, hidden):
    k_map, k_scene = jax.random.split(key)
    return {
        "agent_map_cross_attention": _init_cross_attention(k_map, hidden),
        "agent_scene_cross_attention": _init_cross_attention(k_scene, hidden),
    }


def pack_agent_feature_enhancer_params(params, hidden):
    """One-time packing: fold 1/sqrt(H) into q, concat weights lane-dense."""
    scene = params["agent_scene_cross_attention"]
    lane = params["agent_map_cross_attention"]
    scale = 1.0 / math.sqrt(hidden)
    wq = jnp.concatenate([scene["wq"], lane["wq"]], axis=1) * scale      # [H, 2H]
    bq = jnp.concatenate([scene["bq"], lane["bq"]], axis=1) * scale      # [1, 2H]
    wkv = jnp.concatenate([scene["wk"], scene["wv"],
                           lane["wk"], lane["wv"]], axis=1)              # [H, 4H]
    bkv = jnp.concatenate([scene["bk"], scene["bv"],
                           lane["bk"], lane["bv"]], axis=1)              # [1, 4H]
    return {"wq": wq, "bq": bq,
            "wkv": wkv.astype(jnp.bfloat16), "bkv": bkv}


# ----------------------------- pure-JAX reference ----------------------------

def _reference_forward(params, node_features, agent_feature,
                       input_lengths, lane_polylines):
    B, N, Hd = node_features.shape
    hp = functools.partial(jnp.dot, precision=jax.lax.Precision.HIGHEST)
    rows = []
    for i in range(B):
        L = int(input_lengths[i])
        lp = int(lane_polylines[i])
        agent = agent_feature[i:i + 1]                      # [1, H]

        def attn(p, keys):
            q = hp(agent, p["wq"]) + p["bq"]
            k = hp(keys, p["wk"]) + p["bk"]
            v = hp(keys, p["wv"]) + p["bv"]
            s = hp(q / jnp.sqrt(jnp.float32(Hd)), k.T)
            pr = jax.nn.softmax(s, axis=-1)
            return hp(pr, v)

        scene_ctx = attn(params["agent_scene_cross_attention"],
                         node_features[i, :L])
        lane_ctx = attn(params["agent_map_cross_attention"],
                        node_features[i, lp:L])
        rows.append(jnp.concatenate([agent, scene_ctx, lane_ctx], axis=-1)[0])
    return jnp.stack(rows)


# ----------------------------------- main ------------------------------------

if __name__ == "__main__":
    key = jax.random.PRNGKey(0)
    kp, kn, ka, kn2, ka2, kl2, kp2 = jax.random.split(key, 7)

    Hd = H
    params = init_agent_feature_enhancer(kp, Hd)
    packed = pack_agent_feature_enhancer_params(params, Hd)

    # --- test 1: original small case (single full-batch block) ---------------
    B, N = 2, 16
    node_features = jax.random.normal(kn, (B, N, Hd), jnp.float32)
    agent_feature = jax.random.normal(ka, (B, Hd), jnp.float32)
    input_lengths = jnp.array([16, 10], jnp.int32)
    lane_polylines = jnp.array([4, 3], jnp.int32)

    fwd = jax.jit(functools.partial(agent_feature_enhancer_forward, packed))
    improved = fwd(node_features, agent_feature, input_lengths, lane_polylines)
    jax.block_until_ready(improved)
    assert improved.shape == (B, 3 * Hd)

    ref = _reference_forward(params, node_features, agent_feature,
                             np.asarray(input_lengths), np.asarray(lane_polylines))
    np.testing.assert_allclose(np.asarray(improved), np.asarray(ref),
                               rtol=2e-2, atol=2e-2)

    # --- test 2: batch-tiled + padded path (grid of 3 tiles of TB=8) ---------
    B2 = 20
    node2 = jax.random.normal(kn2, (B2, N, Hd), jnp.float32)
    agent2 = jax.random.normal(ka2, (B2, Hd), jnp.float32)
    lens2 = jax.random.randint(kl2, (B2,), 4, N + 1).astype(jnp.int32)
    lanes2 = jax.random.randint(kp2, (B2,), 0, 4).astype(jnp.int32)

    fwd_tiled = jax.jit(functools.partial(agent_feature_enhancer_forward,
                                          packed, tb=8))
    improved2 = fwd_tiled(node2, agent2, lens2, lanes2)
    jax.block_until_ready(improved2)
    assert improved2.shape == (B2, 3 * Hd)

    ref2 = _reference_forward(params, node2, agent2,
                              np.asarray(lens2), np.asarray(lanes2))
    np.testing.assert_allclose(np.asarray(improved2), np.asarray(ref2),
                               rtol=2e-2, atol=2e-2)

    print("KERNEL_OK")
</pallas_src>

<mosaic_0001>
module attributes {stable_mosaic.version = 11 : i64} {
  func.func @_agent_enhancer_kernel(%arg0: i32, %arg1: memref<2x1xi32, #tpu.memory_space<vmem>>, %arg2: memref<2x1xi32, #tpu.memory_space<vmem>>, %arg3: memref<2x16x32xbf16, #tpu.memory_space<vmem>>, %arg4: memref<2x32xf32, #tpu.memory_space<vmem>>, %arg5: memref<32x64xf32, #tpu.memory_space<vmem>>, %arg6: memref<1x64xf32, #tpu.memory_space<vmem>>, %arg7: memref<32x128xbf16, #tpu.memory_space<vmem>>, %arg8: memref<1x128xf32, #tpu.memory_space<vmem>>, %arg9: memref<2x96xf32, #tpu.memory_space<vmem>>) attributes {dimension_semantics = [#tpu.dimension_semantics<parallel>], iteration_bounds = array<i64: 1>, scalar_prefetch = 0 : i64, scratch_operands = 0 : i64, tpu.core_type = #tpu.core_type<tc>, window_params = [{transform_indices = @transform_0, window_bounds = array<i64: 2, 1>}, {transform_indices = @transform_1, window_bounds = array<i64: 2, 1>}, {transform_indices = @transform_2, window_bounds = array<i64: 2, 16, 32>}, {transform_indices = @transform_3, window_bounds = array<i64: 2, 32>}, {pipeline_mode = #tpu.pipeline_mode<synchronous>, transform_indices = @transform_4, window_bounds = array<i64: 32, 64>}, {pipeline_mode = #tpu.pipeline_mode<synchronous>, transform_indices = @transform_5, window_bounds = array<i64: 1, 64>}, {pipeline_mode = #tpu.pipeline_mode<synchronous>, transform_indices = @transform_6, window_bounds = array<i64: 32, 128>}, {pipeline_mode = #tpu.pipeline_mode<synchronous>, transform_indices = @transform_7, window_bounds = array<i64: 1, 128>}, {transform_indices = @transform_8, window_bounds = array<i64: 2, 96>}]} {
    %c0 = arith.constant 0 : index
    %c0_0 = arith.constant 0 : index
    %0 = vector.load %arg4[%c0, %c0_0] : memref<2x32xf32, #tpu.memory_space<vmem>>, vector<2x32xf32>
    %c0_1 = arith.constant 0 : index
    %c0_2 = arith.constant 0 : index
    %c0_3 = arith.constant 0 : index
    %1 = vector.load %arg3[%c0_1, %c0_2, %c0_3] : memref<2x16x32xbf16, #tpu.memory_space<vmem>>, vector<2x16x32xbf16>
    %c0_4 = arith.constant 0 : index
    %c0_5 = arith.constant 0 : index
    %2 = vector.load %arg5[%c0_4, %c0_5] : memref<32x64xf32, #tpu.memory_space<vmem>>, vector<32x64xf32>
    %cst = arith.constant dense<0.000000e+00> : vector<2x64xf32>
    %3 = tpu.matmul %0, %2, %cst {dimension_numbers = #tpu.dot_dimension_numbers<[1], [0], [0], [1], [0, 0, 1, 1], [], []>} : vector<2x32xf32>, vector<32x64xf32>, vector<2x64xf32> -> vector<2x64xf32>
    %c0_6 = arith.constant 0 : index
    %c0_7 = arith.constant 0 : index
    %4 = vector.load %arg6[%c0_6, %c0_7] : memref<1x64xf32, #tpu.memory_space<vmem>>, vector<1x64xf32>
    %5 = vector.broadcast %4 : vector<1x64xf32> to vector<2x64xf32>
    %6 = arith.addf %3, %5 : vector<2x64xf32>
    %7 = vector.shape_cast %1 : vector<2x16x32xbf16> to vector<32x32xbf16>
    %c0_8 = arith.constant 0 : index
    %c0_9 = arith.constant 0 : index
    %8 = vector.load %arg7[%c0_8, %c0_9] : memref<32x128xbf16, #tpu.memory_space<vmem>>, vector<32x128xbf16>
    %cst_10 = arith.constant dense<0.000000e+00> : vector<32x128xf32>
    %9 = tpu.matmul %7, %8, %cst_10 {dimension_numbers = #tpu.dot_dimension_numbers<[1], [0], [0], [1], [0, 0, 1, 1], [], []>} : vector<32x32xbf16>, vector<32x128xbf16>, vector<32x128xf32> -> vector<32x128xf32>
    %c0_11 = arith.constant 0 : index
    %c0_12 = arith.constant 0 : index
    %10 = vector.load %arg8[%c0_11, %c0_12] : memref<1x128xf32, #tpu.memory_space<vmem>>, vector<1x128xf32>
    %11 = vector.broadcast %10 : vector<1x128xf32> to vector<32x128xf32>
    %12 = arith.addf %9, %11 : vector<32x128xf32>
    %13 = vector.shape_cast %12 : vector<32x128xf32> to vector<2x16x128xf32>
    %14 = tpu.iota {dimensions = array<i32: 1>} : vector<2x16x1xi32>
    %c0_13 = arith.constant 0 : index
    %c0_14 = arith.constant 0 : index
    %15 = vector.load %arg1[%c0_13, %c0_14] : memref<2x1xi32, #tpu.memory_space<vmem>>, vector<2x1xi32>
    %16 = vector.shape_cast %15 : vector<2x1xi32> to vector<2x1x1xi32>
    %c0_15 = arith.constant 0 : index
    %c0_16 = arith.constant 0 : index
    %17 = vector.load %arg2[%c0_15, %c0_16] : memref<2x1xi32, #tpu.memory_space<vmem>>, vector<2x1xi32>
    %18 = vector.shape_cast %17 : vector<2x1xi32> to vector<2x1x1xi32>
    %19 = vector.broadcast %16 : vector<2x1x1xi32> to vector<2x16x1xi32>
    %20 = arith.cmpi slt, %14, %19 : vector<2x16x1xi32>
    %21 = vector.broadcast %18 : vector<2x1x1xi32> to vector<2x16x1xi32>
    %22 = arith.cmpi sge, %14, %21 : vector<2x16x1xi32>
    %23 = vector.broadcast %16 : vector<2x1x1xi32> to vector<2x16x1xi32>
    %24 = arith.cmpi slt, %14, %23 : vector<2x16x1xi32>
    %25 = arith.andi %22, %24 : vector<2x16x1xi1>
    %26 = vector.extract_strided_slice %6 {offsets = [0, 0], sizes = [2, 32], strides = [1, 1]} : vector<2x64xf32> to vector<2x32xf32>
    %27 = vector.extract_strided_slice %13 {offsets = [0, 0, 0], sizes = [2, 16, 32], strides = [1, 1, 1]} : vector<2x16x128xf32> to vector<2x16x32xf32>
    %28 = vector.extract_strided_slice %13 {offsets = [0, 0, 32], sizes = [2, 16, 32], strides = [1, 1, 1]} : vector<2x16x128xf32> to vector<2x16x32xf32>
    %29 = vector.shape_cast %26 : vector<2x32xf32> to vector<2x1x32xf32>
    %30 = vector.broadcast %29 : vector<2x1x32xf32> to vector<2x16x32xf32>
    %31 = arith.mulf %30, %27 : vector<2x16x32xf32>
    %cst_17 = arith.constant dense<0.000000e+00> : vector<2x16xf32>
    %32 = vector.multi_reduction <add>, %31, %cst_17 [2] : vector<2x16x32xf32> to vector<2x16xf32>
    %33 = vector.shape_cast %32 : vector<2x16xf32> to vector<2x16x1xf32>
    %cst_18 = arith.constant -1.000000e+30 : f32
    %34 = vector.broadcast %cst_18 : f32 to vector<2x16x1xf32>
    %35 = arith.select %20, %33, %34 : vector<2x16x1xi1>, vector<2x16x1xf32>
    %cst_19 = arith.constant dense<0xFF800000> : vector<2x1xf32>
    %36 = vector.multi_reduction <maximumf>, %35, %cst_19 [1] : vector<2x16x1xf32> to vector<2x1xf32>
    %37 = vector.shape_cast %36 : vector<2x1xf32> to vector<2x1x1xf32>
    %38 = vector.broadcast %37 : vector<2x1x1xf32> to vector<2x16x1xf32>
    %39 = arith.subf %35, %38 : vector<2x16x1xf32>
    %40 = math.exp %39 : vector<2x16x1xf32>
    %41 = arith.extui %20 : vector<2x16x1xi1> to vector<2x16x1xi32>
    %42 = arith.sitofp %41 : vector<2x16x1xi32> to vector<2x16x1xf32>
    %43 = arith.mulf %40, %42 : vector<2x16x1xf32>
    %cst_20 = arith.constant dense<0.000000e+00> : vector<2x1xf32>
    %44 = vector.multi_reduction <add>, %43, %cst_20 [1] : vector<2x16x1xf32> to vector<2x1xf32>
    %45 = vector.shape_cast %44 : vector<2x1xf32> to vector<2x1x1xf32>
    %cst_21 = arith.constant 1.000000e-30 : f32
    %46 = vector.broadcast %cst_21 : f32 to vector<2x1x1xf32>
    %47 = arith.maximumf %45, %46 : vector<2x1x1xf32>
    %48 = tpu.reciprocal %47 {approx = true} : vector<2x1x1xf32> -> vector<2x1x1xf32>
    %49 = vector.broadcast %48 : vector<2x1x1xf32> to vector<2x16x1xf32>
    %50 = arith.mulf %43, %49 : vector<2x16x1xf32>
    %51 = vector.broadcast %50 : vector<2x16x1xf32> to vector<2x16x32xf32>
    %52 = arith.mulf %51, %28 : vector<2x16x32xf32>
    %cst_22 = arith.constant dense<0.000000e+00> : vector<2x32xf32>
    %53 = vector.multi_reduction <add>, %52, %cst_22 [1] : vector<2x16x32xf32> to vector<2x32xf32>
    %54 = vector.extract_strided_slice %6 {offsets = [0, 32], sizes = [2, 32], strides = [1, 1]} : vector<2x64xf32> to vector<2x32xf32>
    %55 = vector.extract_strided_slice %13 {offsets = [0, 0, 64], sizes = [2, 16, 32], strides = [1, 1, 1]} : vector<2x16x128xf32> to vector<2x16x32xf32>
    %56 = vector.extract_strided_slice %13 {offsets = [0, 0, 96], sizes = [2, 16, 32], strides = [1, 1, 1]} : vector<2x16x128xf32> to vector<2x16x32xf32>
    %57 = vector.shape_cast %54 : vector<2x32xf32> to vector<2x1x32xf32>
    %58 = vector.broadcast %57 : vector<2x1x32xf32> to vector<2x16x32xf32>
    %59 = arith.mulf %58, %55 : vector<2x16x32xf32>
    %cst_23 = arith.constant dense<0.000000e+00> : vector<2x16xf32>
    %60 = vector.multi_reduction <add>, %59, %cst_23 [2] : vector<2x16x32xf32> to vector<2x16xf32>
    %61 = vector.shape_cast %60 : vector<2x16xf32> to vector<2x16x1xf32>
    %cst_24 = arith.constant -1.000000e+30 : f32
    %62 = vector.broadcast %cst_24 : f32 to vector<2x16x1xf32>
    %63 = arith.select %25, %61, %62 : vector<2x16x1xi1>, vector<2x16x1xf32>
    %cst_25 = arith.constant dense<0xFF800000> : vector<2x1xf32>
    %64 = vector.multi_reduction <maximumf>, %63, %cst_25 [1] : vector<2x16x1xf32> to vector<2x1xf32>
    %65 = vector.shape_cast %64 : vector<2x1xf32> to vector<2x1x1xf32>
    %66 = vector.broadcast %65 : vector<2x1x1xf32> to vector<2x16x1xf32>
    %67 = arith.subf %63, %66 : vector<2x16x1xf32>
    %68 = math.exp %67 : vector<2x16x1xf32>
    %69 = arith.extui %25 : vector<2x16x1xi1> to vector<2x16x1xi32>
    %70 = arith.sitofp %69 : vector<2x16x1xi32> to vector<2x16x1xf32>
    %71 = arith.mulf %68, %70 : vector<2x16x1xf32>
    %cst_26 = arith.constant dense<0.000000e+00> : vector<2x1xf32>
    %72 = vector.multi_reduction <add>, %71, %cst_26 [1] : vector<2x16x1xf32> to vector<2x1xf32>
    %73 = vector.shape_cast %72 : vector<2x1xf32> to vector<2x1x1xf32>
    %cst_27 = arith.constant 1.000000e-30 : f32
    %74 = vector.broadcast %cst_27 : f32 to vector<2x1x1xf32>
    %75 = arith.maximumf %73, %74 : vector<2x1x1xf32>
    %76 = tpu.reciprocal %75 {approx = true} : vector<2x1x1xf32> -> vector<2x1x1xf32>
    %77 = vector.broadcast %76 : vector<2x1x1xf32> to vector<2x16x1xf32>
    %78 = arith.mulf %71, %77 : vector<2x16x1xf32>
    %79 = vector.broadcast %78 : vector<2x16x1xf32> to vector<2x16x32xf32>
    %80 = arith.mulf %79, %56 : vector<2x16x32xf32>
    %cst_28 = arith.constant dense<0.000000e+00> : vector<2x32xf32>
    %81 = vector.multi_reduction <add>, %80, %cst_28 [1] : vector<2x16x32xf32> to vector<2x32xf32>
    %82 = tpu.concatenate %0, %53, %81 in 1 : vector<2x32xf32>, vector<2x32xf32>, vector<2x32xf32> -> vector<2x96xf32>
    %c0_29 = arith.constant 0 : index
    %c0_30 = arith.constant 0 : index
    %83 = vector.load %arg9[%c0_29, %c0_30] : memref<2x96xf32, #tpu.memory_space<vmem>>, vector<2x96xf32>
    tpu.vector_store %arg9[%c0_29, %c0_30], %82 {strides = array<i32>} : memref<2x96xf32, #tpu.memory_space<vmem>>, vector<2x96xf32>,
    return
  }
  func.func @transform_0(%arg0: i32) -> (i32, i32) {
    %c0_i32 = arith.constant 0 : i32
    %c0_i32_0 = arith.constant 0 : i32
    return %arg0, %c0_i32 : i32, i32
  }
  func.func @transform_1(%arg0: i32) -> (i32, i32) {
    %c0_i32 = arith.constant 0 : i32
    %c0_i32_0 = arith.constant 0 : i32
    return %arg0, %c0_i32 : i32, i32
  }
  func.func @transform_2(%arg0: i32) -> (i32, i32, i32) {
    %c0_i32 = arith.constant 0 : i32
    %c0_i32_0 = arith.constant 0 : i32
    %c0_i32_1 = arith.constant 0 : i32
    return %arg0, %c0_i32, %c0_i32_0 : i32, i32, i32
  }
  func.func @transform_3(%arg0: i32) -> (i32, i32) {
    %c0_i32 = arith.constant 0 : i32
    %c0_i32_0 = arith.constant 0 : i32
    return %arg0, %c0_i32 : i32, i32
  }
  func.func @transform_4(%arg0: i32) -> (i32, i32) {
    %c0_i32 = arith.constant 0 : i32
    %c0_i32_0 = arith.constant 0 : i32
    %c0_i32_1 = arith.constant 0 : i32
    return %c0_i32, %c0_i32_0 : i32, i32
  }
  func.func @transform_5(%arg0: i32) -> (i32, i32) {
    %c0_i32 = arith.constant 0 : i32
    %c0_i32_0 = arith.constant 0 : i32
    %c0_i32_1 = arith.constant 0 : i32
    return %c0_i32, %c0_i32_0 : i32, i32
  }
  func.func @transform_6(%arg0: i32) -> (i32, i32) {
    %c0_i32 = arith.constant 0 : i32
    %c0_i32_0 = arith.constant 0 : i32
    %c0_i32_1 = arith.constant 0 : i32
    return %c0_i32, %c0_i32_0 : i32, i32
  }
  func.func @transform_7(%arg0: i32) -> (i32, i32) {
    %c0_i32 = arith.constant 0 : i32
    %c0_i32_0 = arith.constant 0 : i32
    %c0_i32_1 = arith.constant 0 : i32
    return %c0_i32, %c0_i32_0 : i32, i32
  }
  func.func @transform_8(%arg0: i32) -> (i32, i32) {
    %c0_i32 = arith.constant 0 : i32
    %c0_i32_0 = arith.constant 0 : i32
    return %arg0, %c0_i32 : i32, i32
  }
}

</mosaic_0001>

<bundles_post_ra>
// kernel: agent_feature_enhancer_forward.1
= control target key start
LH: loop header
LB: loop body
LE: loop exit
PB: predicated region body
PF: predicated region fallthrough
CT: control target
= control target key end

     0   :  { %v749_v1 = vmov 0.0   ;;  %vm750_vm0 = vmmov 0   ;;  %vm47_vm1 = vcmask 261120   ;;  %s1017_s0 = inlined_call_operand.vmem [shape: s32[2,1], index: 0, kind: input, shape index: {}]   ;;  %s1018_s1 = inlined_call_operand.vmem [shape: s32[2,1], index: 1, kind: input, shape index: {}]   ;;  %s1019_s2 = inlined_call_operand.vmem [shape: bf16[2,16,32], index: 2, kind: input, shape index: {}]   ;;  %s1020_s3 = inlined_call_operand.vmem [shape: f32[2,32], index: 3, kind: input, shape index: {}]   ;;  %s1021_s4 = inlined_call_operand.vmem [shape: f32[32,64], index: 4, kind: input, shape index: {}]   ;;  %s1022_s5 = inlined_call_operand.vmem [shape: f32[1,64], index: 5, kind: input, shape index: {}]   ;;  %s1023_s6 = inlined_call_operand.vmem [shape: bf16[32,128], index: 6, kind: input, shape index: {}]   ;;  %s1024_s7 = inlined_call_operand.vmem [shape: f32[1,128], index: 7, kind: input, shape index: {}]   ;;  %s1025_s8 = inlined_call_operand.hbm [shape: f32[2,96], index: 8, kind: output, shape index: {}]  }
   0x1   :  { %v39_v0 = vld [vmem:[%s1021_s4 + $0x18] sm:$0xff]  ;;  %672 = vmatprep.subr.mxu0 %v749_v1  ;;  %v699_v2 = vld [vmem:[%s1023_s6 + $0x8] sm:$0xff]   ;;  %v38_v3 = vld [vmem:[%s1021_s4 + $0x10] sm:$0xff]  ;;  %680 = vmatprep.mubr.msk.f32.mxu0 %vm750_vm0, %v749_v1 }
   0x2   :  { %673 = vmatpush3.msra.mxu0 %v39_v0  ;;  %v700_v4 = vld [vmem:[%s1023_s6] sm:$0xff]   ;;  %683 = vmatprep.subr.bf16.mxu1 %v699_v2  ;;  %v37_v5 = vld [vmem:[%s1021_s4 + $0x8] sm:$0xff] }
   0x3   :  { %674 = vmatprep.subr.mxu0 %v749_v1  ;;  %684 = vmatpush3.bf16.msra.mxu1 %v699_v2  ;;  %v701_v6 = vld [vmem:[%s1019_s2] sm:$0xff]  }
   0x4   :  { %675 = vmatpush3.msra.mxu0 %v38_v3  ;;  %685 = vmatprep.subr.bf16.mxu1 %v700_v4  ;;  %v36_v7 = vld [vmem:[%s1021_s4] sm:$0xff] }
   0x5   :  { %676 = vmatprep.subr.mxu0 %v749_v1  ;;  %v828_v8 = vld [vmem:[%s1020_s3] sm:$0x3]  ;;  %687 = vmatprep.mubr.msk.bf16.mxu1 %vm47_vm1, %v701_v6 }
   0x6   :  { %677 = vmatpush3.msra.mxu0 %v37_v5 }
   0x7   :  { %13 = vsyncpa [#allocation3], 0  ;;  %678 = vmatprep.subr.mxu0 %v749_v1  ;;  %v702_v9 = vld [vmem:[%s1019_s2 + $0x8] sm:$0xff]   ;;  %686 = vmatpush3.bf16.msra.mxu1 %v700_v4  ;;  %v646_v11 = vld [vmem:[%s1024_s7] ss:$0 sm:$0xff]  ;;  %s751_s2 = smov 96   ;;  %v209_v21 = vlaneseq }
   0x8   :  { %679 = vmatpush3.msra.mxu0 %v36_v7  ;;  %v752_v22 = vmov 1966171168   ;;  %v644_v26 = vld [vmem:[%s1022_s5] ss:$0 sm:$0xff]  ;;  %v753_v60 = vmov 0   ;;  %vm339_vm10 = vcmask 7168  }
   0x9   :  { %681 = vmatmul.mubr.msk.f32.vlgmr.msra.gmra.mxu0 %vm47_vm1, %v828_v8  ;;  %v222_v23 = vunpack.c.l.s4 %v752_v22  ;;  %v857_v24 = vshrl.u32 %v209_v21, 7  ;;  %698 = vset.pattern.permute.xlu0 %v753_v60  ;;  %v653_v61 = vld.sshfl [vmem:[%s1017_s0] sm:$0x11 pattern:$0x75316420]  ;;  %vm595_vm15 = vcmask 1048320  }
   0xa   :  { %688 = vmatmul.mubr.msk.bf16.vlgmr.msra.gmra.mxu1 %vm47_vm1, %v702_v9  ;;  %697 = vset.pattern.permute.xlu1 %v753_v60  ;;  %v654_v62 = vld.sshfl [vmem:[%s1018_s1] sm:$0x11 pattern:$0x75316420]  ;;  %v220_v2 = vcombine.high %v653_v61, %v653_v61  ;;  %vm616_vm0 = vcmask 1041409   ;;  %s754_s0 = smov [#allocation2]  }
   0xb   :  { %v223_v25 = vunpack.c.0.s8 %v222_v23  ;;  %v260_v30 = vsub.s32 0, %v857_v24  ;;  %v243_v3 = vcombine.high %v654_v62, %v654_v62  ;;  %v889_v9 = vadd.s32 8, %v857_v24  ;;  %s636_s1 = sshll.u32 %s754_s0, 4  ;;  %s637_s1 = int_to_ptr.vmem [resolvable:$true] %s636_s1 }
   0xc   :  { %s727_s26 = scalar_lea.vmem %s637_s1, 32  ;;  %p732_p1 = scmp.lt.s32.totalorder %s637_s1, %s637_s1 }
   0xd   :  { %v226_v28 = vsub.s32 %v223_v25, %v857_v24  ;;  %p728_p0 = scmp.ne.s32.totalorder %s637_s1, %s727_s26  ;;  %p733_p2 = scmp.lt.s32.totalorder %s727_s26, %s727_s26 }
   0xf   :  { %v227_v63 = vrot.slane %v653_v61, %v226_v28  ;;  %v250_v0 = vrot.slane %v654_v62, %v226_v28  ;;  %v234_v6 = vrot.slane %v220_v2, %v226_v28  ;;  %v257_v7 = vrot.slane %v243_v3, %v226_v28  ;;  %p734_p3 = por %p733_p2, %p732_p1 }
  0x11   :  { %v886_v4 = vrot.slane %v227_v63, %v260_v30  ;;  %v273_v5 = vrot.slane %v250_v0, %v260_v30  ;;  %p735_p4 = pnand %p734_p3, %p728_p0 }
  0x13   :  { %vm266_vm2 = vcmp.lt.s32.totalorder %v857_v24, %v886_v4  ;;  %vm278_vm3 = vcmp.ge.s32.totalorder %v857_v24, %v273_v5  ;;  %vm267_vm4 = vcmp.lt.s32.totalorder %v889_v9, %v886_v4  ;;  %vm279_vm5 = vcmp.ge.s32.totalorder %v889_v9, %v273_v5 }
  0x14   :  { %vm902_vm6 = vmand %vm278_vm3, %vm266_vm2  ;;  %vm626_vm3 = vcmask 523264  }
  0x15   :  { %vm912_vm9 = vmand %vm279_vm5, %vm267_vm4 }
  0xc9   :  { %v117_v10 = vpop.f32.mrf.mxu0 }
  0xca   :  { %v689_v12 = vpop.f32.mrf.mxu1  ;;  %v118_v27 = vadd.f32 %v644_v26, %v117_v10  ;;  %v894_v10 = vrot.slane %v234_v6, %v260_v30 }
  0xcb   :  { %v682_v13 = vpop.f32.mrf.mxu0  ;;  %v841_v14 = vadd.f32 %v689_v12, %v646_v11 }
  0xcc   :  { %v194_v15 = vpop.f32.mrf.mxu1  ;;  %v293_v29 = vrot.slane %v118_v27, %v226_v28  ;;  %vm268_vm7 = vcmp.lt.s32.totalorder %v857_v24, %v894_v10  ;;  %vm269_vm11 = vcmp.lt.s32.totalorder %v889_v9, %v894_v10 }
  0xcd   :  { %v843_v16 = vadd.f32 %v646_v11, %v194_v15  ;;  %459 = vrot.lane.b32.xlu1 %v841_v14, %s751_s2 }
  0xce   :  { %v690_v17 = vpop.f32.mrf.mxu1  ;;  %v294_v31 = vcombine.high %v293_v29, %v293_v29  ;;  %v301_v32 = vrot.slane %v293_v29, %v226_v28 }
  0xcf   :  { %v847_v18 = vadd.f32 %v690_v17, %v646_v11  ;;  %455 = vrot.lane.b32.xlu0 %v843_v16, %s751_s2 }
  0xd0   :  { %v197_v19 = vpop.f32.mrf.mxu1  ;;  %v308_v33 = vrot.slane %v294_v31, %v226_v28  ;;  %v312_v34 = vrot.slane %v301_v32, %v260_v30 }
  0xd1   :  { %v851_v20 = vadd.f32 %v646_v11, %v197_v19  ;;  %461 = vrot.lane.b32.xlu1 %v847_v18, %s751_s2  ;;  %v277_v11 = vrot.slane %v257_v7, %v260_v30 }
  0xd2   :  { %v316_v38 = vrot.slane %v308_v33, %v260_v30  ;;  %v319_v50 = vmul.f32 %v312_v34, %v843_v16 }
  0xd3   :  { %457 = vrot.lane.b32.xlu0 %v851_v20, %s751_s2  ;;  %v320_v54 = vmul.f32 %v312_v34, %v851_v20  ;;  %vm280_vm8 = vcmp.ge.s32.totalorder %v857_v24, %v277_v11  ;;  %vm281_vm12 = vcmp.ge.s32.totalorder %v889_v9, %v277_v11 }
  0xd4   :  { %v323_v52 = vsel %vm47_vm1, %v319_v50, 0.0  ;;  %v321_v55 = vmul.f32 %v316_v38, %v841_v14  ;;  %v322_v58 = vmul.f32 %v316_v38, %v847_v18  ;;  %vm924_vm13 = vmand %vm280_vm8, %vm268_vm7 }
  0xd5   :  { %v326_v56 = vsel %vm47_vm1, %v320_v54, 0.0  ;;  %vm935_vm14 = vmand %vm281_vm12, %vm269_vm11 }
  0xd6   :  { %v329_v57 = vsel %vm47_vm1, %v321_v55, 0.0  ;;  %v332_v59 = vsel %vm47_vm1, %v322_v58, 0.0 }
 0x13f   :  { %v460_v35 = vpop.permute.xlu1 %459 }
 0x140   :  { %v469_v40 = vmul.f32 %v460_v35, %v316_v38 }
 0x141   :  { %v456_v36 = vpop.permute.xlu0 %455 }
 0x142   :  { %v467_v37 = vmul.f32 %v456_v36, %v312_v34 }
 0x143   :  { %v462_v42 = vpop.permute.xlu1 %461 }
 0x144   :  { %475 = vrot.lane.b32.xlu0 %v467_v37, %s751_s2  ;;  %v470_v43 = vmul.f32 %v462_v42, %v316_v38 }
 0x145   :  { %v458_v39 = vpop.permute.xlu0 %457 }
 0x146   :  { %v468_v41 = vmul.f32 %v458_v39, %v312_v34 }
 0x148   :  { %477 = vrot.lane.b32.xlu1 %v468_v41, %s751_s2  ;;  %479 = vrot.lane.b32.xlu0 %v469_v40, %s751_s2 }
 0x14c   :  { %481 = vrot.lane.b32.xlu1 %v470_v43, %s751_s2 }
 0x1b6   :  { %v476_v44 = vpop.permute.xlu0 %475 }
 0x1b7   :  { %v487_v45 = vsel %vm47_vm1, %v476_v44, 0.0 }
 0x1b8   :  { %488 = vadd.xlane.f32.xlu0 %v487_v45 }
 0x1ba   :  { %v478_v46 = vpop.permute.xlu1 %477  ;;  %v480_v47 = vpop.permute.xlu0 %479 }
 0x1bb   :  { %v490_v48 = vsel %vm47_vm1, %v478_v46, 0.0  ;;  %v493_v49 = vsel %vm47_vm1, %v480_v47, 0.0 }
 0x1bc   :  { %491 = vadd.xlane.f32.xlu1 %v490_v48  ;;  %494 = vadd.xlane.f32.xlu0 %v493_v49 }
 0x1be   :  { %v482_v51 = vpop.permute.xlu1 %481 }
 0x1bf   :  { %v496_v53 = vsel %vm47_vm1, %v482_v51, 0.0 }
 0x1c0   :  { %324 = vadd.xlane.f32.xlu1 %v323_v52  ;;  %497 = vadd.xlane.f32.xlu0 %v496_v53 }
 0x1c4   :  { %327 = vadd.xlane.f32.xlu0 %v326_v56  ;;  %330 = vadd.xlane.f32.xlu1 %v329_v57 }
 0x1c8   :  { %333 = vadd.xlane.f32.xlu0 %v332_v59 }
 0x241   :  { %v489_v13 = vpop.xlane.xlu0 %488 }
 0x242   :  { %v499_v17 = vsel %vm902_vm6, %v489_v13, -1e+30 }
 0x243   :  { %v503_v25 = vsel %vm339_vm10, %v499_v17, -inf }
 0x245   :  { %v492_v19 = vpop.xlane.xlu1 %491  ;;  %v495_v22 = vpop.xlane.xlu0 %494 }
 0x246   :  { %v500_v23 = vsel %vm912_vm9, %v492_v19, -1e+30  ;;  %v501_v29 = vsel %vm924_vm13, %v495_v22, -1e+30 }
 0x247   :  { %v504_v26 = vsel %vm339_vm10, %v500_v23, -inf  ;;  %v512_v34 = vsel %vm339_vm10, %v501_v29, -inf }
 0x248   :  { %v505_v28 = vmax.f32 %v503_v25, %v504_v26 }
 0x249   :  { %v325_v30 = vpop.xlane.xlu1 %324  ;;  %v498_v31 = vpop.xlane.xlu0 %497 }
 0x24a   :  { %v506_v32 = vrot.slane %v505_v28, 4  ;;  %v502_v33 = vsel %vm935_vm14, %v498_v31, -1e+30  ;;  %v335_v37 = vsel %vm266_vm2, %v325_v30, -1e+30 }
 0x24b   :  { %v513_v35 = vsel %vm339_vm10, %v502_v33, -inf  ;;  %v340_v44 = vsel %vm339_vm10, %v335_v37, -inf }
 0x24c   :  { %v507_v36 = vmax.f32 %v505_v28, %v506_v32  ;;  %v514_v38 = vmax.f32 %v512_v34, %v513_v35 }
 0x24d   :  { %v328_v39 = vpop.xlane.xlu0 %327  ;;  %v331_v40 = vpop.xlane.xlu1 %330 }
 0x24e   :  { %v508_v41 = vrot.slane %v507_v36, 2  ;;  %v515_v42 = vrot.slane %v514_v38, 4  ;;  %v336_v43 = vsel %vm267_vm4, %v328_v39, -1e+30  ;;  %v337_v49 = vsel %vm268_vm7, %v331_v40, -1e+30 }
 0x24f   :  { %v341_v45 = vsel %vm339_vm10, %v336_v43, -inf  ;;  %v349_v55 = vsel %vm339_vm10, %v337_v49, -inf }
 0x250   :  { %v509_v46 = vmax.f32 %v507_v36, %v508_v41  ;;  %v516_v47 = vmax.f32 %v514_v38, %v515_v42  ;;  %v342_v48 = vmax.f32 %v340_v44, %v341_v45  ;;  %v661_v45 = vsel %vm924_vm13, 1.0, %v749_v1 }
 0x251   :  { %v334_v50 = vpop.xlane.xlu0 %333 }
 0x252   :  { %v510_v51 = vrot.slane %v509_v46, 1  ;;  %v517_v52 = vrot.slane %v516_v47, 2  ;;  %v343_v53 = vrot.slane %v342_v48, 4  ;;  %v338_v54 = vsel %vm269_vm11, %v334_v50, -1e+30 }
 0x253   :  { %v350_v56 = vsel %vm339_vm10, %v338_v54, -inf }
 0x254   :  { %v511_v57 = vmax.f32 %v509_v46, %v510_v51  ;;  %v518_v58 = vmax.f32 %v516_v47, %v517_v52  ;;  %v344_v59 = vmax.f32 %v342_v48, %v343_v53  ;;  %v351_v60 = vmax.f32 %v349_v55, %v350_v56 }
 0x255   :  { %v662_v46 = vsel %vm935_vm14, 1.0, %v749_v1  ;;  %v655_v51 = vsel %vm266_vm2, 1.0, %v749_v1  ;;  %v656_v52 = vsel %vm267_vm4, 1.0, %v749_v1  ;;  %vm432_vm2 = vcmask 523520  }
 0x256   :  { %v521_v61 = vsub.f32 %v499_v17, %v511_v57  ;;  %v522_v62 = vsub.f32 %v500_v23, %v511_v57  ;;  %v519_v63 = vrot.slane %v518_v58, 1  ;;  %v345_v0 = vrot.slane %v344_v59, 2 }
 0x257   :  { %v352_v2 = vrot.slane %v351_v60, 4  ;;  %vm628_vm4 = vcmask 779264  }
 0x258   :  { %v525_v3 = vmul.f32 1.442695, %v521_v61  ;;  %v527_v5 = vmul.f32 1.442695, %v522_v62  ;;  %v520_v6 = vmax.f32 %v518_v58, %v519_v63  ;;  %v346_v7 = vmax.f32 %v344_v59, %v345_v0 }
 0x259   :  { %v353_v11 = vmax.f32 %v351_v60, %v352_v2  ;;  %v657_v62 = vsel %vm268_vm7, 1.0, %v749_v1  ;;  %v658_v0 = vsel %vm269_vm11, 1.0, %v749_v1 }
 0x25a   :  { %703 = vpow2.f32 %v525_v3  ;;  %v523_v13 = vsub.f32 %v501_v29, %v520_v6  ;;  %v524_v19 = vsub.f32 %v502_v33, %v520_v6  ;;  %v347_v22 = vrot.slane %v346_v7, 1 }
 0x25b   :  { %705 = vpow2.f32 %v527_v5  ;;  %v354_v25 = vrot.slane %v353_v11, 2  ;;  %v659_v33 = vsel %vm902_vm6, 1.0, %v749_v1 }
 0x25c   :  { %v529_v26 = vmul.f32 1.442695, %v523_v13  ;;  %v531_v28 = vmul.f32 1.442695, %v524_v19  ;;  %v348_v30 = vmax.f32 %v346_v7, %v347_v22 }
 0x25d   :  { %v355_v31 = vmax.f32 %v353_v11, %v354_v25 }
 0x25e   :  { %707 = vpow2.f32 %v529_v26  ;;  %v358_v17 = vsub.f32 %v335_v37, %v348_v30  ;;  %v359_v23 = vsub.f32 %v336_v43, %v348_v30  ;;  %v660_v37 = vsel %vm912_vm9, 1.0, %v749_v1 }
 0x25f   :  { %709 = vpow2.f32 %v531_v28  ;;  %v356_v32 = vrot.slane %v355_v31, 1 }
 0x260   :  { %v362_v34 = vmul.f32 1.442695, %v358_v17  ;;  %v364_v35 = vmul.f32 1.442695, %v359_v23 }
 0x261   :  { %v357_v36 = vmax.f32 %v355_v31, %v356_v32 }
 0x262   :  { %711 = vpow2.f32 %v362_v34 }
 0x263   :  { %713 = vpow2.f32 %v364_v35  ;;  %v360_v38 = vsub.f32 %v337_v49, %v357_v36  ;;  %v361_v29 = vsub.f32 %v338_v54, %v357_v36 }
 0x265   :  { %v366_v39 = vmul.f32 1.442695, %v360_v38  ;;  %v368_v40 = vmul.f32 1.442695, %v361_v29 }
 0x267   :  { %v704_v41 = vpop.eup %703  ;;  %715 = vpow2.f32 %v366_v39 }
 0x268   :  { %v706_v42 = vpop.eup %705  ;;  %v967_v43 = vmul.f32 %v704_v41, %v659_v33  ;;  %717 = vpow2.f32 %v368_v40 }
 0x269   :  { %v542_v44 = vmul.f32 %v706_v42, %v660_v37 }
 0x26a   :  { %v545_v12 = vsel %vm339_vm10, %v967_v43, 0.0 }
 0x26b   :  { %v708_v15 = vpop.eup %707  ;;  %v546_v47 = vsel %vm339_vm10, %v542_v44, 0.0 }
 0x26c   :  { %v710_v48 = vpop.eup %709  ;;  %v547_v49 = vadd.f32 %v546_v47, %v545_v12  ;;  %v543_v50 = vmul.f32 %v708_v15, %v661_v45 }
 0x26d   :  { %v544_v21 = vmul.f32 %v710_v48, %v662_v46 }
 0x26e   :  { %v548_v53 = vrot.slane %v547_v49, 4  ;;  %v554_v27 = vsel %vm339_vm10, %v543_v50, 0.0 }
 0x26f   :  { %v712_v54 = vpop.eup %711  ;;  %v555_v55 = vsel %vm339_vm10, %v544_v21, 0.0 }
 0x270   :  { %v714_v56 = vpop.eup %713  ;;  %v549_v57 = vadd.f32 %v548_v53, %v547_v49  ;;  %v556_v58 = vadd.f32 %v555_v55, %v554_v27  ;;  %v378_v59 = vmul.f32 %v712_v54, %v655_v51 }
 0x271   :  { %v379_v60 = vmul.f32 %v714_v56, %v656_v52 }
 0x272   :  { %v550_v61 = vrot.slane %v549_v57, 2  ;;  %v557_v63 = vrot.slane %v556_v58, 4  ;;  %v382_v4 = vsel %vm339_vm10, %v378_v59, 0.0 }
 0x273   :  { %v383_v2 = vsel %vm339_vm10, %v379_v60, 0.0 }
 0x274   :  { %v716_v3 = vpop.eup %715  ;;  %v551_v5 = vadd.f32 %v550_v61, %v549_v57  ;;  %v558_v6 = vadd.f32 %v557_v63, %v556_v58  ;;  %v384_v7 = vadd.f32 %v383_v2, %v382_v4 }
 0x275   :  { %v718_v11 = vpop.eup %717  ;;  %v380_v13 = vmul.f32 %v716_v3, %v657_v62 }
 0x276   :  { %v552_v19 = vrot.slane %v551_v5, 1  ;;  %v559_v22 = vrot.slane %v558_v6, 2  ;;  %v385_v24 = vrot.slane %v384_v7, 4  ;;  %v381_v25 = vmul.f32 %v718_v11, %v658_v0 }
 0x277   :  { %v391_v26 = vsel %vm339_vm10, %v380_v13, 0.0 }
 0x278   :  { %v553_v28 = vadd.f32 %v552_v19, %v551_v5  ;;  %v560_v30 = vadd.f32 %v559_v22, %v558_v6  ;;  %v386_v31 = vadd.f32 %v385_v24, %v384_v7  ;;  %v392_v9 = vsel %vm339_vm10, %v381_v25, 0.0 }
 0x279   :  { %v393_v1 = vadd.f32 %v392_v9, %v391_v26 }
 0x27a   :  { %v563_v10 = vmax.f32 %v553_v28, 1e-30  ;;  %v561_v17 = vrot.slane %v560_v30, 1  ;;  %v387_v23 = vrot.slane %v386_v31, 2 }
 0x27b   :  { %v394_v32 = vrot.slane %v393_v1, 4 }
 0x27c   :  { %719 = vrcp.f32 %v563_v10  ;;  %v562_v34 = vadd.f32 %v561_v17, %v560_v30  ;;  %v388_v35 = vadd.f32 %v387_v23, %v386_v31 }
 0x27d   :  { %v395_v36 = vadd.f32 %v394_v32, %v393_v1 }
 0x27e   :  { %v564_v38 = vmax.f32 %v562_v34, 1e-30  ;;  %v389_v29 = vrot.slane %v388_v35, 1 }
 0x27f   :  { %v396_v33 = vrot.slane %v395_v36, 2 }
 0x280   :  { %721 = vrcp.f32 %v564_v38  ;;  %v390_v39 = vadd.f32 %v389_v29, %v388_v35 }
 0x281   :  { %v397_v40 = vadd.f32 %v396_v33, %v395_v36 }
 0x282   :  { %v400_v37 = vmax.f32 %v390_v39, 1e-30 }
 0x283   :  { %v398_v41 = vrot.slane %v397_v40, 1 }
 0x284   :  { %723 = vrcp.f32 %v400_v37 }
 0x285   :  { %v399_v42 = vadd.f32 %v398_v41, %v397_v40 }
 0x287   :  { %v401_v15 = vmax.f32 %v399_v42, 1e-30 }
 0x289   :  { %v720_v45 = vpop.eup %719  ;;  %725 = vrcp.f32 %v401_v15 }
 0x28a   :  { %v568_v12 = vmul.f32 %v720_v45, %v542_v44  ;;  %v567_v46 = vmul.f32 %v720_v45, %v967_v43 }
 0x28c   :  { %578 = vperm.xlu0 %698, %v568_v12   ;;  %573 = vperm.xlu1 %697, %v567_v46  }
 0x28d   :  { %v722_v47 = vpop.eup %721 }
 0x28e   :  { %v569_v48 = vmul.f32 %v722_v47, %v543_v50  ;;  %v570_v49 = vmul.f32 %v722_v47, %v544_v21 }
 0x290   :  { %583 = vperm.xlu1 %697, %v569_v48  }
 0x291   :  { %v724_v51 = vpop.eup %723 }
 0x292   :  { %v404_v52 = vmul.f32 %v724_v51, %v378_v59  ;;  %v405_v53 = vmul.f32 %v724_v51, %v379_v60 }
 0x294   :  { %588 = vperm.xlu1 %697, %v570_v49  }
 0x296   :  { %v726_v27 = vpop.eup %725 }
 0x297   :  { %v406_v54 = vmul.f32 %v726_v27, %v380_v13  ;;  %v407_v44 = vmul.f32 %v726_v27, %v381_v25 }
 0x298   :  { %410 = vperm.xlu1 %697, %v404_v52  }
 0x29c   :  { %415 = vperm.xlu1 %697, %v405_v53  }
 0x2a0   :  { %420 = vperm.xlu1 %697, %v406_v54  }
 0x2a4   :  { %425 = vperm.xlu1 %697, %v407_v44  }
 0x307   :  { %v579_v43 = vpop.permute.xlu0 %578  ;;  %v574_v55 = vpop.permute.xlu1 %573 }
 0x308   :  { %v592_v56 = vmul.f32 %v579_v43, %v851_v20  ;;  %v591_v50 = vmul.f32 %v574_v55, %v843_v16 }
 0x30a   :  { %v597_v57 = vsel %vm595_vm15, %v592_v56, 0.0  ;;  %v596_v21 = vsel %vm595_vm15, %v591_v50, 0.0 }
 0x30b   :  { %v598_v58 = vadd.f32 %v597_v57, %v596_v21  ;;  %v584_v61 = vpop.permute.xlu1 %583 }
 0x30c   :  { %v593_v60 = vmul.f32 %v584_v61, %v841_v14 }
 0x30d   :  { %v599_v59 = vrot.slane %v598_v58, 4 }
 0x30e   :  { %v605_v0 = vsel %vm595_vm15, %v593_v60, 0.0 }
 0x30f   :  { %v600_v62 = vadd.f32 %v599_v59, %v598_v58  ;;  %v589_v63 = vpop.permute.xlu1 %588 }
 0x310   :  { %v594_v4 = vmul.f32 %v589_v63, %v847_v18 }
 0x311   :  { %v601_v3 = vrot.slane %v600_v62, 2 }
 0x312   :  { %v606_v2 = vsel %vm595_vm15, %v594_v4, 0.0 }
 0x313   :  { %v607_v5 = vadd.f32 %v606_v2, %v605_v0  ;;  %v602_v7 = vadd.f32 %v601_v3, %v600_v62  ;;  %v411_v30 = vpop.permute.xlu1 %410 }
 0x314   :  { %v428_v32 = vmul.f32 %v411_v30, %v843_v16 }
 0x315   :  { %v608_v6 = vrot.slane %v607_v5, 4  ;;  %v603_v22 = vrot.slane %v602_v7, 1 }
 0x316   :  { %v433_v29 = vsel %vm432_vm2, %v428_v32, 0.0 }
 0x317   :  { %v609_v11 = vadd.f32 %v608_v6, %v607_v5  ;;  %v604_v25 = vadd.f32 %v603_v22, %v602_v7  ;;  %v416_v31 = vpop.permute.xlu1 %415 }
 0x318   :  { %v429_v17 = vmul.f32 %v416_v31, %v851_v20 }
 0x319   :  { %v610_v13 = vrot.slane %v609_v11, 2 }
 0x31a   :  { %v434_v35 = vsel %vm432_vm2, %v429_v17, 0.0 }
 0x31b   :  { %v611_v19 = vadd.f32 %v610_v13, %v609_v11  ;;  %v421_v9 = vpop.permute.xlu1 %420  ;;  %v435_v33 = vadd.f32 %v434_v35, %v433_v29 }
 0x31c   :  { %v430_v23 = vmul.f32 %v421_v9, %v841_v14 }
 0x31d   :  { %v612_v24 = vrot.slane %v611_v19, 1  ;;  %v436_v40 = vrot.slane %v435_v33, 4 }
 0x31e   :  { %v442_v36 = vsel %vm432_vm2, %v430_v23, 0.0 }
 0x31f   :  { %v613_v26 = vadd.f32 %v612_v24, %v611_v19  ;;  %v426_v1 = vpop.permute.xlu1 %425  ;;  %v437_v41 = vadd.f32 %v436_v40, %v435_v33 }
 0x320   :  { %v431_v10 = vmul.f32 %v426_v1, %v847_v18 }
 0x321   :  { %v621_v28 = vsel %vm616_vm0, %v613_v26, %v604_v25  ;;  %v438_v45 = vrot.slane %v437_v41, 2 }
 0x322   :  { %622 = vrot.lane.b32.xlu1 %v621_v28, %s751_s2  ;;  %v443_v34 = vsel %vm432_vm2, %v431_v10, 0.0 }
 0x323   :  { %v444_v38 = vadd.f32 %v443_v34, %v442_v36  ;;  %v439_v12 = vadd.f32 %v438_v45, %v437_v41 }
 0x325   :  { %v445_v39 = vrot.slane %v444_v38, 4  ;;  %v440_v46 = vrot.slane %v439_v12, 1 }
 0x327   :  { %v446_v37 = vadd.f32 %v445_v39, %v444_v38  ;;  %v441_v15 = vadd.f32 %v440_v46, %v439_v12 }
 0x329   :  { %v447_v42 = vrot.slane %v446_v37, 2 }
 0x32b   :  { %v448_v18 = vadd.f32 %v447_v42, %v446_v37 }
 0x32d   :  { %v449_v20 = vrot.slane %v448_v18, 1 }
 0x32f   :  { %v450_v14 = vadd.f32 %v449_v20, %v448_v18 }
 0x331   :  { %v617_v16 = vsel %vm616_vm0, %v450_v14, %v441_v15 }
 0x332   :  { %v625_v47 = vsel %vm47_vm1, %v828_v8, %v617_v16 }
 0x394   :  { %v623_v48 = vpop.permute.xlu1 %622 }
 0x395   :  { %v627_v49 = vsel %vm626_vm3, %v625_v47, %v623_v48 }
 0x396   :  { %629 = vst.msk [vmem:[#allocation2] sm:$0x3] %vm628_vm4, %v627_v49 }
 0x397   :  { %738 = shalt.err (!%p735_p4)
}
 0x398   :  { %639 = dma.vmem_to_hbm [thread:$0]  %s637_s1, 32, %s1025_s8, [#allocation3]  }
 0x399   :  { %747 = dma.done.wait [#allocation3], 32  }
 0x39a   :  { %748 = vsyncadd [#allocation3], 4294967264 }
 0x39b   :  { %643 = vsyncpa [#allocation3], 1 }

</bundles_post_ra>
